<compile_context>
chip_gen: v7x
topology: tpu7x:2x2x1
jax: 0.10.0
libtpu: 0.0.40
codegen_flags: <defaults>
</compile_context>

<pallas_src>
import functools

import jax
import jax.numpy as jnp
from jax.experimental import pallas as pl
from jax.experimental.pallas import tpu as pltpu

_LANES = 128


def _bmc_nll_kernel(w_ref, inv2nv_ref, pred_ref, tgt_ref, out_ref, acc_ref,
                    *, num_classes: int, n_valid: int, row_tile: int):
    """One grid step = (list element l, row-chunk r) of that element's samples.

    w_ref     : (L, C) f32 SMEM   — prefolded weights  w_c = counts_c * exp(-c^2 k)
    inv2nv_ref: (1, 1) f32 SMEM   — k = 1 / (2 * noise_var)
    pred_ref  : (1, row_tile, 128) f32 VMEM
    tgt_ref   : (1, row_tile, 128) bf16 VMEM (labels, exact small ints)
    out_ref   : (1, 1, 128) f32 VMEM — per-element mean NLL broadcast across lanes
    acc_ref   : (1, 1) f32 VMEM scratch — running NLL sum for the current element
    """
    l = pl.program_id(0)
    r = pl.program_id(1)

    @pl.when(r == 0)
    def _init():
        acc_ref[...] = jnp.zeros_like(acc_ref)

    k = inv2nv_ref[0, 0]                              # 1 / (2 * noise_var)
    pred = pred_ref[0]                                # (row_tile, 128) f32
    tgt = tgt_ref[0].astype(jnp.float32)              # labels as f32

    # Factored, overflow-safe weighted-softmax denominator:
    #   sum_c counts_c e^{-k(p-c)^2}
    #     = e^{-k p^2} * e^{q*c_ref} * sum_{j=0}^{C-1} coeff_j * e1^j
    # with q = 2kp, e1 = e^{-|q|} in (0,1], c_ref = C if q>=0 else 1,
    #      coeff_j = w_{C-j} if q>=0 else w_{j+1},   w_c = counts_c e^{-k c^2}.
    q = 2.0 * k * pred
    pos = q >= 0.0
    c_ref = jnp.where(pos, jnp.float32(num_classes), jnp.float32(1.0))
    e1 = jnp.exp(-jnp.abs(q))                         # single EUP exp per sample

    s = jnp.zeros_like(pred)
    pw = jnp.ones_like(pred)
    for j in range(num_classes):                      # static unroll, pure VPU work
        coeff = jnp.where(pos, w_ref[l, num_classes - 1 - j], w_ref[l, j])
        s = s + coeff * pw
        if j + 1 < num_classes:
            pw = pw * e1

    # nll = k (p - t)^2 + log(sum_c counts_c e^{-k(p-c)^2})
    #     = k ((p-t)^2 - p^2) + q*c_ref + log(s)
    d = pred - tgt
    nll = k * (d * d - pred * pred) + q * c_ref + jnp.log(s)

    # Mask out padded samples (each element padded up to a multiple of row_tile*128).
    row = jax.lax.broadcasted_iota(jnp.int32, pred.shape, 0)
    lane = jax.lax.broadcasted_iota(jnp.int32, pred.shape, 1)
    idx = (r * row_tile + row) * _LANES + lane
    nll = jnp.where(idx < n_valid, nll, 0.0)

    # One small per-tile reduction into the running accumulator.
    acc_ref[...] += jnp.sum(nll, keepdims=True)

    @pl.when(r == pl.num_programs(1) - 1)
    def _finalize():
        mean_nll = acc_ref[0, 0] * jnp.float32(1.0 / n_valid)
        out_ref[...] = jnp.full(out_ref.shape, mean_nll, dtype=out_ref.dtype)


def bmc_loss_forward(pred, target, noise_sigma, num_classes: int):
    """BMCLoss.forward: `pred` may be a list of (N,1)/(N,) arrays or a single array."""
    if isinstance(pred, (list, tuple)):
        pred2 = jnp.stack([jnp.reshape(p, (-1,)) for p in pred]).astype(jnp.float32)
        tgt2 = jnp.stack([jnp.reshape(t, (-1,)) for t in target]).astype(jnp.int32)
    else:
        pred2 = jnp.reshape(pred, (1, -1)).astype(jnp.float32)
        tgt2 = jnp.reshape(target, (1, -1)).astype(jnp.int32)

    num_elems, n = pred2.shape
    noise_var = jnp.asarray(noise_sigma, jnp.float32) ** 2
    inv2nv = 1.0 / (2.0 * noise_var)

    # --- hoisted + prefolded per-element class weights (outside the kernel) -------
    classes_f = jnp.arange(1, num_classes + 1, dtype=jnp.float32)            # (C,)
    counts = jnp.sum(
        tgt2[:, :, None] == jnp.arange(1, num_classes + 1, dtype=jnp.int32),
        axis=1).astype(jnp.float32)                                          # (L, C)
    # NOTE: like the original torch formula, this underflows for extremely small
    # noise_sigma; matches the reproduced (unstabilized) semantics otherwise.
    w = counts * jnp.exp(-inv2nv * classes_f * classes_f)[None, :]           # (L, C)

    # --- vreg-dense packing: pad each element's N samples to (rows, 128) ----------
    rows_needed = -(-n // _LANES)
    row_tile = min(128, ((rows_needed + 15) // 16) * 16)   # mult of 16 (bf16 tiling)
    chunk = row_tile * _LANES
    n_pad = ((n + chunk - 1) // chunk) * chunk
    r_rows = n_pad // _LANES
    num_row_blocks = n_pad // chunk

    pred3 = jnp.pad(pred2, ((0, 0), (0, n_pad - n))).reshape(num_elems, r_rows, _LANES)
    tgt3 = (jnp.pad(tgt2, ((0, 0), (0, n_pad - n)), constant_values=1)
            .reshape(num_elems, r_rows, _LANES).astype(jnp.bfloat16))

    kernel = functools.partial(_bmc_nll_kernel, num_classes=num_classes,
                               n_valid=n, row_tile=row_tile)
    cost = pl.CostEstimate(
        flops=int(num_elems * n_pad * (3 * num_classes + 16)),
        transcendentals=int(2 * num_elems * n_pad),
        bytes_accessed=int(num_elems * n_pad * 6
                           + num_elems * num_classes * 4
                           + num_elems * _LANES * 4),
    )

    out = pl.pallas_call(
        kernel,
        out_shape=jax.ShapeDtypeStruct((num_elems, 1, _LANES), jnp.float32),
        grid=(num_elems, num_row_blocks),
        in_specs=[
            pl.BlockSpec(memory_space=pltpu.MemorySpace.SMEM),           # w (L, C)
            pl.BlockSpec(memory_space=pltpu.MemorySpace.SMEM),           # 1/(2nv)
            pl.BlockSpec((1, row_tile, _LANES), lambda l, r: (l, r, 0)),  # pred
            pl.BlockSpec((1, row_tile, _LANES), lambda l, r: (l, r, 0)),  # tgt (bf16)
        ],
        out_specs=pl.BlockSpec((1, 1, _LANES), lambda l, r: (l, 0, 0)),
        scratch_shapes=[pltpu.VMEM((1, 1), jnp.float32)],
        compiler_params=pltpu.CompilerParams(
            dimension_semantics=("parallel", "arbitrary"),
            vmem_limit_bytes=32 * 1024 * 1024),
        cost_estimate=cost,
    )(w, jnp.reshape(inv2nv, (1, 1)).astype(jnp.float32), pred3, tgt3)

    per_element_nll = out[:, 0, 0]                                # (L,)
    scale = jax.lax.stop_gradient(2.0 * noise_var)                # torch .detach()
    return jnp.mean(per_element_nll) * scale


if __name__ == "__main__":
    key = jax.random.PRNGKey(0)

    L = 3              # length of the pred/target lists
    N = 8              # samples per list element
    C = 4              # number of classes (labels in 1..C, all present per element)
    NOISE_SIGMA = 2.0  # module's init_noise_sigma

    pred_list, target_list = [], []
    for i in range(L):
        key, kp = jax.random.split(key)
        # continuous predictions around (and slightly outside) the label range
        pred_i = jax.random.uniform(kp, (N, 1), jnp.float32, minval=-1.0, maxval=4.5)
        # deterministic labels covering every class 1..C
        tgt_i = (jnp.arange(N, dtype=jnp.int32) + i) % C + 1
        pred_list.append(pred_i)
        target_list.append(tgt_i)

    loss = bmc_loss_forward(pred_list, target_list, NOISE_SIGMA, num_classes=C)
    jax.block_until_ready(loss)

    # pure-JAX reference mirroring the PyTorch module (assumes unique(target) == [1..C]).
    def ref_bmc_one(p, t, noise_var):
        u = jnp.arange(1, C + 1, dtype=jnp.float32)
        logits = -(p.reshape(-1, 1) - u) ** 2 / (2.0 * noise_var)          # (N, C)
        counts = (t.reshape(-1, 1) == jnp.arange(1, C + 1)).sum(0)         # (C,)
        log_soft = logits - jnp.log((jnp.exp(logits) * counts).sum(1, keepdims=True))
        picked = jnp.take_along_axis(log_soft, (t - 1).reshape(-1, 1), axis=1)
        return -picked.mean() * (2.0 * noise_var)

    nv = jnp.float32(NOISE_SIGMA) ** 2
    ref = jnp.stack(
        [ref_bmc_one(p, t, nv) for p, t in zip(pred_list, target_list)]
    ).mean()

    assert jnp.allclose(loss, ref, rtol=1e-4, atol=1e-4), (loss, ref)

    print("KERNEL_OK")
</pallas_src>

<mosaic_0001>
module attributes {stable_mosaic.version = 11 : i64} {
  func.func @_bmc_nll_kernel(%arg0: i32, %arg1: i32, %arg2: memref<3x4xf32, #tpu.memory_space<smem>>, %arg3: memref<1x1xf32, #tpu.memory_space<smem>>, %arg4: memref<1x16x128xf32, #tpu.memory_space<vmem>>, %arg5: memref<1x16x128xbf16, #tpu.memory_space<vmem>>, %arg6: memref<1x1x128xf32, #tpu.memory_space<vmem>>, %arg7: memref<1x1xf32, #tpu.memory_space<vmem>>) attributes {dimension_semantics = [#tpu.dimension_semantics<parallel>, #tpu.dimension_semantics<arbitrary>], iteration_bounds = array<i64: 3, 1>, scalar_prefetch = 0 : i64, scratch_operands = 1 : i64, tpu.core_type = #tpu.core_type<tc>, window_params = [{transform_indices = @transform_0, window_bounds = array<i64: 3, 4>}, {transform_indices = @transform_1, window_bounds = array<i64: 1, 1>}, {transform_indices = @transform_2, window_bounds = array<i64: 1, 16, 128>}, {transform_indices = @transform_3, window_bounds = array<i64: 1, 16, 128>}, {transform_indices = @transform_4, window_bounds = array<i64: 1, 1, 128>}]} {
    %c0_i32 = arith.constant 0 : i32
    %0 = arith.cmpi eq, %arg1, %c0_i32 : i32
    %1 = arith.extui %0 : i1 to i32
    %c0_i32_0 = arith.constant 0 : i32
    %2 = arith.cmpi ne, %1, %c0_i32_0 : i32
    scf.if %2 {
      %cst_27 = arith.constant 0.000000e+00 : f32
      %95 = vector.broadcast %cst_27 : f32 to vector<1x1xf32>
      %c0_28 = arith.constant 0 : index
      %c0_29 = arith.constant 0 : index
      %96 = vector.load %arg7[%c0_28, %c0_29] : memref<1x1xf32, #tpu.memory_space<vmem>>, vector<1x1xf32>
      tpu.vector_store %arg7[%c0_28, %c0_29], %95 {strides = array<i32>} : memref<1x1xf32, #tpu.memory_space<vmem>>, vector<1x1xf32>,
    } else {
    }
    %c0 = arith.constant 0 : index
    %c0_1 = arith.constant 0 : index
    %3 = memref.load %arg3[%c0, %c0_1] : memref<1x1xf32, #tpu.memory_space<smem>>
    %c0_2 = arith.constant 0 : index
    %c0_3 = arith.constant 0 : index
    %c0_4 = arith.constant 0 : index
    %4 = vector.load %arg4[%c0_2, %c0_3, %c0_4] : memref<1x16x128xf32, #tpu.memory_space<vmem>>, vector<1x16x128xf32>
    %5 = vector.shape_cast %4 : vector<1x16x128xf32> to vector<16x128xf32>
    %c0_5 = arith.constant 0 : index
    %c0_6 = arith.constant 0 : index
    %c0_7 = arith.constant 0 : index
    %6 = vector.load %arg5[%c0_5, %c0_6, %c0_7] : memref<1x16x128xbf16, #tpu.memory_space<vmem>>, vector<1x16x128xbf16>
    %7 = vector.shape_cast %6 : vector<1x16x128xbf16> to vector<16x128xbf16>
    %8 = arith.extf %7 : vector<16x128xbf16> to vector<16x128xf32>
    %cst = arith.constant 2.000000e+00 : f32
    %9 = arith.mulf %cst, %3 : f32
    %10 = vector.broadcast %9 : f32 to vector<16x128xf32>
    %11 = arith.mulf %10, %5 : vector<16x128xf32>
    %cst_8 = arith.constant 0.000000e+00 : f32
    %12 = vector.broadcast %cst_8 : f32 to vector<16x128xf32>
    %13 = arith.cmpf oge, %11, %12 : vector<16x128xf32>
    %cst_9 = arith.constant 4.000000e+00 : f32
    %cst_10 = arith.constant 1.000000e+00 : f32
    %14 = vector.broadcast %cst_9 : f32 to vector<16x128xf32>
    %15 = vector.broadcast %cst_10 : f32 to vector<16x128xf32>
    %16 = arith.select %13, %14, %15 : vector<16x128xi1>, vector<16x128xf32>
    %17 = math.absf %11 : vector<16x128xf32>
    %cst_11 = arith.constant 0.000000e+00 : f32
    %18 = vector.broadcast %cst_11 : f32 to vector<16x128xf32>
    %19 = arith.subf %18, %17 : vector<16x128xf32>
    %20 = math.exp %19 : vector<16x128xf32>
    %cst_12 = arith.constant 0.000000e+00 : f32
    %21 = vector.broadcast %cst_12 : f32 to vector<16x128xf32>
    %cst_13 = arith.constant 1.000000e+00 : f32
    %22 = vector.broadcast %cst_13 : f32 to vector<16x128xf32>
    %23 = arith.index_cast %arg0 : i32 to index
    %c3 = arith.constant 3 : index
    %24 = memref.load %arg2[%23, %c3] : memref<3x4xf32, #tpu.memory_space<smem>>
    %25 = arith.index_cast %arg0 : i32 to index
    %c0_14 = arith.constant 0 : index
    %26 = memref.load %arg2[%25, %c0_14] : memref<3x4xf32, #tpu.memory_space<smem>>
    %27 = vector.broadcast %24 : f32 to vector<16x128xf32>
    %28 = vector.broadcast %26 : f32 to vector<16x128xf32>
    %29 = arith.select %13, %27, %28 : vector<16x128xi1>, vector<16x128xf32>
    %30 = arith.mulf %29, %22 : vector<16x128xf32>
    %31 = arith.addf %21, %30 : vector<16x128xf32>
    %32 = arith.mulf %22, %20 : vector<16x128xf32>
    %33 = arith.index_cast %arg0 : i32 to index
    %c2 = arith.constant 2 : index
    %34 = memref.load %arg2[%33, %c2] : memref<3x4xf32, #tpu.memory_space<smem>>
    %35 = arith.index_cast %arg0 : i32 to index
    %c1 = arith.constant 1 : index
    %36 = memref.load %arg2[%35, %c1] : memref<3x4xf32, #tpu.memory_space<smem>>
    %37 = vector.broadcast %34 : f32 to vector<16x128xf32>
    %38 = vector.broadcast %36 : f32 to vector<16x128xf32>
    %39 = arith.select %13, %37, %38 : vector<16x128xi1>, vector<16x128xf32>
    %40 = arith.mulf %39, %32 : vector<16x128xf32>
    %41 = arith.addf %31, %40 : vector<16x128xf32>
    %42 = arith.mulf %32, %20 : vector<16x128xf32>
    %43 = arith.index_cast %arg0 : i32 to index
    %c1_15 = arith.constant 1 : index
    %44 = memref.load %arg2[%43, %c1_15] : memref<3x4xf32, #tpu.memory_space<smem>>
    %45 = arith.index_cast %arg0 : i32 to index
    %c2_16 = arith.constant 2 : index
    %46 = memref.load %arg2[%45, %c2_16] : memref<3x4xf32, #tpu.memory_space<smem>>
    %47 = vector.broadcast %44 : f32 to vector<16x128xf32>
    %48 = vector.broadcast %46 : f32 to vector<16x128xf32>
    %49 = arith.select %13, %47, %48 : vector<16x128xi1>, vector<16x128xf32>
    %50 = arith.mulf %49, %42 : vector<16x128xf32>
    %51 = arith.addf %41, %50 : vector<16x128xf32>
    %52 = arith.mulf %42, %20 : vector<16x128xf32>
    %53 = arith.index_cast %arg0 : i32 to index
    %c0_17 = arith.constant 0 : index
    %54 = memref.load %arg2[%53, %c0_17] : memref<3x4xf32, #tpu.memory_space<smem>>
    %55 = arith.index_cast %arg0 : i32 to index
    %c3_18 = arith.constant 3 : index
    %56 = memref.load %arg2[%55, %c3_18] : memref<3x4xf32, #tpu.memory_space<smem>>
    %57 = vector.broadcast %54 : f32 to vector<16x128xf32>
    %58 = vector.broadcast %56 : f32 to vector<16x128xf32>
    %59 = arith.select %13, %57, %58 : vector<16x128xi1>, vector<16x128xf32>
    %60 = arith.mulf %59, %52 : vector<16x128xf32>
    %61 = arith.addf %51, %60 : vector<16x128xf32>
    %62 = arith.subf %5, %8 : vector<16x128xf32>
    %63 = arith.mulf %62, %62 : vector<16x128xf32>
    %64 = arith.mulf %5, %5 : vector<16x128xf32>
    %65 = arith.subf %63, %64 : vector<16x128xf32>
    %66 = vector.broadcast %3 : f32 to vector<16x128xf32>
    %67 = arith.mulf %66, %65 : vector<16x128xf32>
    %68 = arith.mulf %11, %16 : vector<16x128xf32>
    %69 = arith.addf %67, %68 : vector<16x128xf32>
    %70 = math.log %61 : vector<16x128xf32>
    %71 = arith.addf %69, %70 : vector<16x128xf32>
    %72 = tpu.iota {dimensions = array<i32: 0>} : vector<16x128xi32>
    %73 = tpu.iota {dimensions = array<i32: 1>} : vector<16x128xi32>
    %c16_i32 = arith.constant 16 : i32
    %74 = arith.muli %arg1, %c16_i32 : i32
    %75 = vector.broadcast %74 : i32 to vector<16x128xi32>
    %76 = arith.addi %75, %72 : vector<16x128xi32>
    %c128_i32 = arith.constant 128 : i32
    %77 = vector.broadcast %c128_i32 : i32 to vector<16x128xi32>
    %78 = arith.muli %76, %77 : vector<16x128xi32>
    %79 = arith.addi %78, %73 : vector<16x128xi32>
    %c8_i32 = arith.constant 8 : i32
    %80 = vector.broadcast %c8_i32 : i32 to vector<16x128xi32>
    %81 = arith.cmpi slt, %79, %80 : vector<16x128xi32>
    %cst_19 = arith.constant 0.000000e+00 : f32
    %82 = vector.broadcast %cst_19 : f32 to vector<16x128xf32>
    %83 = arith.select %81, %71, %82 : vector<16x128xi1>, vector<16x128xf32>
    %c0_20 = arith.constant 0 : index
    %c0_21 = arith.constant 0 : index
    %84 = vector.load %arg7[%c0_20, %c0_21] : memref<1x1xf32, #tpu.memory_space<vmem>>, vector<1x1xf32>
    %85 = vector.shape_cast %83 : vector<16x128xf32> to vector<1x16x128xf32>
    %cst_22 = arith.constant dense<0.000000e+00> : vector<1xf32>
    %86 = vector.multi_reduction <add>, %85, %cst_22 [1, 2] : vector<1x16x128xf32> to vector<1xf32>
    %87 = vector.shape_cast %86 : vector<1xf32> to vector<1x1x1xf32>
    %88 = vector.extract %87[0, 0, 0] : f32 from vector<1x1x1xf32>
    %89 = vector.broadcast %88 : f32 to vector<1x1xf32>
    %90 = arith.addf %84, %89 : vector<1x1xf32>
    %c0_23 = arith.constant 0 : index
    %c0_24 = arith.constant 0 : index
    %91 = vector.load %arg7[%c0_23, %c0_24] : memref<1x1xf32, #tpu.memory_space<vmem>>, vector<1x1xf32>
    tpu.vector_store %arg7[%c0_23, %c0_24], %90 {strides = array<i32>} : memref<1x1xf32, #tpu.memory_space<vmem>>, vector<1x1xf32>,
    %c0_i32_25 = arith.constant 0 : i32
    %92 = arith.cmpi eq, %arg1, %c0_i32_25 : i32
    %93 = arith.extui %92 : i1 to i32
    %c0_i32_26 = arith.constant 0 : i32
    %94 = arith.cmpi ne, %93, %c0_i32_26 : i32
    scf.if %94 {
      %c0_27 = arith.constant 0 : index
      %c0_28 = arith.constant 0 : index
      %95 = vector.load %arg7[%c0_27, %c0_28] : memref<1x1xf32, #tpu.memory_space<vmem>>, vector<1x1xf32>
      %96 = vector.extract %95[0, 0] : f32 from vector<1x1xf32>
      %cst_29 = arith.constant 1.250000e-01 : f32
      %97 = arith.mulf %96, %cst_29 : f32
      %98 = vector.broadcast %97 : f32 to vector<1x1x128xf32>
      %c0_30 = arith.constant 0 : index
      %c0_31 = arith.constant 0 : index
      %c0_32 = arith.constant 0 : index
      %99 = vector.load %arg6[%c0_30, %c0_31, %c0_32] : memref<1x1x128xf32, #tpu.memory_space<vmem>>, vector<1x1x128xf32>
      tpu.vector_store %arg6[%c0_30, %c0_31, %c0_32], %98 {strides = array<i32>} : memref<1x1x128xf32, #tpu.memory_space<vmem>>, vector<1x1x128xf32>,
    } else {
    }
    return
  }
  func.func @transform_0(%arg0: i32, %arg1: i32) -> (i32, i32) {
    %c0_i32 = arith.constant 0 : i32
    %c0_i32_0 = arith.constant 0 : i32
    %c0_i32_1 = arith.constant 0 : i32
    return %c0_i32, %c0_i32_0 : i32, i32
  }
  func.func @transform_1(%arg0: i32, %arg1: i32) -> (i32, i32) {
    %c0_i32 = arith.constant 0 : i32
    %c0_i32_0 = arith.constant 0 : i32
    %c0_i32_1 = arith.constant 0 : i32
    return %c0_i32, %c0_i32_0 : i32, i32
  }
  func.func @transform_2(%arg0: i32, %arg1: i32) -> (i32, i32, i32) {
    %c0_i32 = arith.constant 0 : i32
    %c0_i32_0 = arith.constant 0 : i32
    return %arg0, %arg1, %c0_i32 : i32, i32, i32
  }
  func.func @transform_3(%arg0: i32, %arg1: i32) -> (i32, i32, i32) {
    %c0_i32 = arith.constant 0 : i32
    %c0_i32_0 = arith.constant 0 : i32
    return %arg0, %arg1, %c0_i32 : i32, i32, i32
  }
  func.func @transform_4(%arg0: i32, %arg1: i32) -> (i32, i32, i32) {
    %c0_i32 = arith.constant 0 : i32
    %c0_i32_0 = arith.constant 0 : i32
    %c0_i32_1 = arith.constant 0 : i32
    return %arg0, %c0_i32, %c0_i32_0 : i32, i32, i32
  }
}

</mosaic_0001>

<bundles_post_ra>
// kernel: tpu_custom_call.1
= control target key start
LH: loop header
LB: loop body
LE: loop exit
PB: predicated region body
PF: predicated region fallthrough
CT: control target
= control target key end

     0   :  { %s1147_s0 = inlined_call_operand.hbm [shape: f32[3,4], index: 0, kind: input, shape index: {}]   ;;  %s1148_s1 = inlined_call_operand.<no memory space> [shape: f32[1,1], index: 1, kind: input, shape index: {}]   ;;  %s1149_s2 = inlined_call_operand.hbm [shape: f32[3,16,128], index: 2, kind: input, shape index: {}]   ;;  %s1150_s3 = inlined_call_operand.hbm [shape: bf16[3,16,128], index: 3, kind: input, shape index: {}]   ;;  %s1151_s4 = inlined_call_operand.hbm [shape: f32[3,1,128], index: 4, kind: output, shape index: {}]  }
   0x1   :  { %1156 = sst [smem:[#allocation16_spill]] %s1147_s0 }
   0x2   :  { %1157 = sst [smem:[#allocation17_spill]] %s1149_s2 }
   0x3   :  { %9 = sst [smem:[#allocation3]] %s1148_s1 }
   0x4   :  { %10 = vsyncpa [#allocation7], 0 }
   0x5   :  { %11 = vsyncpa [#allocation5], 0 }
   0x6   :  { %13 = vsyncpa [#allocation5 + $0x1], 0 }
   0x7   :  { %14 = vsyncpa [#allocation10], 0 }
   0x8   :  { %16 = vsyncpa [#allocation10 + $0x1], 0 }
   0x9   :  { %17 = vsyncpa [#allocation6], 0 }
   0xa   :  { %19 = vsyncpa [#allocation6 + $0x1], 0  ;;  %s870_s17 = smov 0   ;;  %s872_s18 = smov 0  }
   0xb   :  { %s874_s19 = smov 0   ;;  %s876_s20 = smov 0  }
   0xc   :  { %s878_s21 = smov 0   ;;  %s880_s22 = smov 0  }
   0xd LB: > { %s546_s1 = sadd.s32 4294967295, %s830_s22   ;;  %s547_s23 = sadd.s32 4294967294, %s830_s22   ;;  %s830_s22 = sphi %s880_s22, %s25_s22   ;;  %s826_s21 = sphi %s878_s21, %s1174_s21   ;;  %s822_s20 = sphi %s876_s20, %s1173_s20   ;;  %s818_s19 = sphi %s874_s19, %s1172_s19   ;;  %s814_s18 = sphi %s872_s18, %s1171_s18   ;;  %s810_s17 = sphi %s870_s17, %s1170_s17  }
   0xe   : > { %s88_s24 = sadd.s32 1, %s818_s19  ;;  %p95_p0 = scmp.ne.s32.totalorder %s818_s19, %s814_s18 }
   0xf   : > { %p96_p1 = scmp.eq.s32.totalorder %s830_s22, 0  ;;  %p101_p2 = scmp.ne.s32.totalorder %s814_s18, %s810_s17 }
  0x10   : > { %p908_p3 = scmp.eq.s32.totalorder %s546_s1, 0  ;;  %p153_p4 = scmp.eq.s32.totalorder %s546_s1, 2 }
  0x11   : > { %p97_p5 = por %p96_p1, %p95_p0  ;;  %p159_p6 = scmp.eq.s32.totalorder %s547_s23, 2 }
  0x12   : > { %s1158_s25 = scalar_select %p908_p3, 1, 0 }
  0x13   : > { %p914_p7 = por %p908_p3, %p101_p2  ;;  %p918_p8 = por %p153_p4, %p95_p0 }
  0x14   : > { %p922_p9 = por %p159_p6, %p101_p2  ;;  %p548_p10 = scmp.ge.s32.totalorder %s830_s22, 1 }
  0x15   : > { %s1159_s26 = scalar_select %p914_p7, 1, 0 }
  0x16   : > { %s1160_s27 = scalar_select %p918_p8, 1, 0 }
  0x17   : > { %s1161_s28 = scalar_select %p922_p9, 1, 0 }
  0x18   : > { %p166_p11 = scmp.lt.s32.totalorder %s830_s22, 4  ;;  %p601_p13 = scmp.lt.s32.totalorder %s830_s22, 3 }
  0x19   : > { %s934_s30 = sand.u32 1, %s818_s19   ;;  %s37_s6 = sadd.s32 1, %s826_s21 }
  0x1a   : > { %p928_p12 = pnand %p548_p10, %p166_p11  ;;  %p938_p1 = pnand %p601_p13, %p97_p5 }
  0x1b   : > { %s551_s7 = sshll.u32 %s934_s30, 4  ;;  %p39_p4 = scmp.ge.s32.totalorder %s37_s6, 3 }
  0x1c   : > { %p585_p0 = pneg %p928_p12  ;;  %s1164_s0 = sld [smem:[#allocation16_spill]] }
  0x1e   : > { %p586_p2 = pnand %p585_p0, %p908_p3 }
  0x20   : > { %p669_p10 = pneg %p586_p2 }
  0x22   : > { %s667_s10 = scalar_lea.hbm %s1164_s0, 64 }
  0x23   : > { %p668_p6 = scmp.ne.s32.totalorder %s1164_s0, %s667_s10  ;;  %p674_p5 = scmp.lt.u32.totalorder %s667_s10, %s1164_s0 }
  0x25   : > { %p670_p11 = pnand %p669_p10, %p668_p6 }
  0x27   : > { %p671_p9 = pneg %p670_p11 }
  0x29   : > { %p676_p13 = pnand %p674_p5, %p671_p9 }
  0x2b   : > { %679 = shalt.err (!%p676_p13)
}
  0x2c   : > { %s832_s15 = smov [#allocation4]   ;;  %s1176_s6 = smov (%p39_p4, %s37_s6), 0 }
  0x2d   : > { %588 = dma.hbm_to_smem (!%p586_p2), %s1164_s0, 64, %s832_s15, [#allocation7]  }
  0x2e   : > { %s565_s23 = sshll.u32 %s826_s21, 8  ;;  %s83_s8 = ssub.s32 %s826_s21, %s1176_s6 }
  0x2f   : > { %s1165_s2 = sld [smem:[#allocation17_spill]]  ;;  %p86_p9 = scmp.eq.s32.totalorder %s83_s8, 0 }
  0x30   : > { %s195_s12 = scalar_lea.vmem [#allocation8], %s551_s7  ;;  %s192_s15 = scalar_lea.sflag [#allocation5], %s934_s30 }
  0x31   : > { %s204_s13 = sshll.u32 %s195_s12, 4  ;;  %p682_p2 = pneg %p938_p1  ;;  %s968_s13 = int_to_ptr.vmem [resolvable:$true] %s204_s13 }
  0x32   : > { %s973_s14 = scalar_select %p86_p9, %s818_s19, %s88_s24  }
  0x35   : > { %s966_s11 = scalar_lea.hbm %s1165_s2, %s565_s23  ;;  %s685_s8 = scalar_lea.hbm %s1165_s2, 768 }
  0x36   : > { %s680_s16 = scalar_lea.hbm %s966_s11, 256  ;;  %p686_p10 = scmp.lt.u32.totalorder %s966_s11, %s1165_s2 }
  0x37   : > { %p681_p0 = scmp.ne.s32.totalorder %s966_s11, %s680_s16  ;;  %p687_p11 = scmp.lt.u32.totalorder %s685_s8, %s680_s16 }
  0x38   : > { %p689_p13 = scmp.lt.u32.totalorder %s680_s16, %s966_s11 }
  0x39   : > { %p683_p4 = pnand %p682_p2, %p681_p0  ;;  %p688_p5 = por %p687_p11, %p686_p10 }
  0x3b   : > { %p684_p6 = pneg %p683_p4  ;;  %p690_p9 = por %p689_p13, %p688_p5 }
  0x3d   : > { %p691_p8 = pnand %p690_p9, %p684_p6 }
  0x3f   : > { %694 = shalt.err (!%p691_p8)
}
  0x40   : > { %s695_s24 = scalar_lea.vmem %s968_s13, 256  ;;  %s833_s10 = smov [#allocation8]  }
  0x41   : > { %p696_p0 = scmp.ne.s32.totalorder %s968_s13, %s695_s24  ;;  %s700_s12 = sshll.u32 %s833_s10, 4  ;;  %s701_s12 = int_to_ptr.vmem [resolvable:$false] %s700_s12 }
  0x42   : > { %s702_s1 = scalar_lea.vmem %s701_s12, 512  ;;  %p703_p3 = scmp.lt.s32.totalorder %s968_s13, %s701_s12 }
  0x43   : > { %p698_p4 = pnand %p696_p0, %p682_p2  ;;  %p704_p10 = scmp.lt.s32.totalorder %s702_s1, %s695_s24 }
  0x45   : > { %p699_p7 = pneg %p698_p4  ;;  %p705_p11 = por %p704_p10, %p703_p3 }
  0x47   : > { %p706_p5 = pnand %p705_p11, %p699_p7 }
  0x49   : > { %709 = shalt.err (!%p706_p5)
}
  0x4a   : > { %s834_s16 = smov 128   ;;  %s835_s23 = smov 8  }
  0x4b   : > { %592 = dma.hbm_to_vmem [thread:$0]  (!%p938_p1), %s966_s11, 256, %s968_s13, %s192_s15, %s834_s16, %s834_s16, %s835_s23  }
  0x4c   : > { %s554_s8 = sshll.u32 %s934_s30, 3  ;;  %s566_s7 = sshll.u32 %s826_s21, 7 }
  0x4d   : > { %s1008_s10 = scalar_lea.hbm %s1150_s3, %s566_s7  ;;  %s218_s12 = scalar_lea.vmem [#allocation9], %s554_s8 }
  0x4e   : > { %s227_s1 = sshll.u32 %s218_s12, 4  ;;  %s215_s0 = scalar_lea.sflag [#allocation10], %s934_s30  ;;  %s1010_s1 = int_to_ptr.vmem [resolvable:$true] %s227_s1 }
  0x4f   : > { %s710_s2 = scalar_lea.hbm %s1008_s10, 128  ;;  %s715_s15 = scalar_lea.hbm %s1150_s3, 384 }
  0x50   : > { %p711_p3 = scmp.ne.s32.totalorder %s1008_s10, %s710_s2  ;;  %p716_p6 = scmp.lt.u32.totalorder %s1008_s10, %s1150_s3 }
  0x51   : > { %p717_p13 = scmp.lt.u32.totalorder %s715_s15, %s710_s2  ;;  %p719_p0 = scmp.lt.u32.totalorder %s710_s2, %s1008_s10 }
  0x52   : > { %p713_p7 = pnand %p711_p3, %p682_p2 }
  0x53   : > { %p718_p9 = por %p717_p13, %p716_p6 }
  0x54   : > { %p714_p8 = pneg %p713_p7 }
  0x55   : > { %p720_p4 = por %p719_p0, %p718_p9 }
  0x57   : > { %p721_p10 = pnand %p720_p4, %p714_p8 }
  0x59   : > { %724 = shalt.err (!%p721_p10)
}
  0x5a   : > { %s725_s8 = scalar_lea.vmem %s1010_s1, 128  ;;  %s836_s7 = smov [#allocation9]  }
  0x5b   : > { %p726_p11 = scmp.ne.s32.totalorder %s1010_s1, %s725_s8  ;;  %s730_s9 = sshll.u32 %s836_s7, 4  ;;  %s731_s9 = int_to_ptr.vmem [resolvable:$false] %s730_s9 }
  0x5c   : > { %s732_s24 = scalar_lea.vmem %s731_s9, 256  ;;  %p733_p7 = scmp.lt.s32.totalorder %s1010_s1, %s731_s9 }
  0x5d   : > { %p728_p5 = pnand %p726_p11, %p682_p2  ;;  %p734_p6 = scmp.lt.s32.totalorder %s732_s24, %s725_s8 }
  0x5f   : > { %p729_p3 = pneg %p728_p5  ;;  %p735_p13 = por %p734_p6, %p733_p7 }
  0x61   : > { %p736_p9 = pnand %p735_p13, %p729_p3 }
  0x63   : > { %739 = shalt.err (!%p736_p9)
}
  0x64   : > { %s837_s2 = smov 64   ;;  %s838_s12 = smov 4  }
  0x65   : > { %595 = dma.hbm_to_vmem [thread:$0]  (!%p938_p1), %s1008_s10, 128, %s1010_s1, %s215_s0, %s837_s2, %s837_s2, %s838_s12  }
  0x66   : > { %239 = sbr.rel (%p928_p12) target bundleno = 456 (0x1c8), region = 36  ;;  %p1166_p2 = scmp.ne.s32.totalorder (!%p928_p12), %s1158_s25, 0 }
  0x6d   : > { %793 = dma.done.wait (%p1166_p2), [#allocation7], 64  }
  0x6e   : > { %795 = vsyncadd (%p1166_p2), [#allocation7], 4294967232  ;;  %s1045_s11 = sand.u32 1, %s814_s18   ;;  %p1167_p8 = scmp.ne.s32.totalorder %s1159_s26, 0 }
  0x6f   : > { %s559_s13 = sshll.u32 %s1045_s11, 4  ;;  %s246_s15 = scalar_lea.sflag [#allocation5], %s1045_s11 }
  0x70   : > { %s249_s5 = scalar_lea.vmem [#allocation8], %s559_s13 }
  0x71   : > { %797 = dma.done.wait (%p1167_p8), %s246_s15, 256  }
  0x72   : > { %799 = vsyncadd (%p1167_p8), %s246_s15, 4294967040  ;;  %s560_s0 = sshll.u32 %s1045_s11, 3  ;;  %s255_s25 = scalar_lea.sflag [#allocation10], %s1045_s11 }
  0x73   : > { %s258_s29 = scalar_lea.vmem [#allocation9], %s560_s0 }
  0x74   : > { %801 = dma.done.wait (%p1167_p8), %s255_s25, 128  }
  0x75   : > { %803 = vsyncadd (%p1167_p8), %s255_s25, 4294967168 }
  0x76   : > { %263 = sfence }
  0x77   : > { %s1059_s30 = sld [smem:[#allocation3]]  ;;  %v297_v0 = vld [vmem:[%s249_s5] sm:$0xff]  ;;  %v298_v1 = vld [vmem:[%s249_s5 + $0x8] sm:$0xff]  ;;  %s561_s1 = sshll.u32 %s822_s20, 7  ;;  %v378_v24 = vlaneseq  ;;  %v839_v54 = vmov 1.0   ;;  %vm294_vm4 = vcmask 0  }
  0x78   : > { %s329_s26 = sadd.s32 2, %s561_s1  ;;  %s331_s16 = sadd.s32 1, %s561_s1  ;;  %v568_v11 = vld [vmem:[%s258_s29] sm:$0xff]   ;;  %v361_v43 = vmul.f32 %v297_v0, %v297_v0  ;;  %v362_v50 = vmul.f32 %v298_v1, %v298_v1 }
  0x79   : > { %s320_s23 = sadd.s32 3, %s561_s1  ;;  %s330_s8 = sld [smem:[#allocation4 + %s329_s26]]  ;;  %v569_v14 = vunpack.c.l.bf16 %v568_v11  ;;  %v570_v17 = vunpack.c.h.bf16 %v568_v11  ;;  %v379_v47 = vshrl.u32 %v378_v24, 7  ;;  %v382_v59 = vand.u32 127, %v378_v24 }
  0x7a   : > { %s332_s7 = sld [smem:[#allocation4 + %s331_s16]]  ;;  %s287_s12 = scalar_lea.vmem [#allocation11], %s1045_s11 }
  0x7b   : > { %s321_s9 = sld [smem:[#allocation4 + %s320_s23]]  ;;  %v357_v23 = vsub.f32 %v297_v0, %v569_v14  ;;  %v358_v33 = vsub.f32 %v298_v1, %v570_v17  ;;  %v380_v53 = vadd.s32 8, %v379_v47  ;;  %v387_v60 = vmul.u32 128, %v379_v47  ;;  %s431_s13 = sshll.u32 %s287_s12, 4  ;;  %s1101_s13 = int_to_ptr.vmem [resolvable:$true] %s431_s13 }
  0x7c   : > { %s322_s24 = sld [smem:[#allocation4 + %s561_s1]]  ;;  %s562_s15 = sshll.u32 %s822_s20, 4 }
  0x7d   : > { %s303_s10 = smul.f32 2.0, %s1059_s30  ;;  %v359_v46 = vmul.f32 %v357_v23, %v357_v23  ;;  %v360_v49 = vmul.f32 %v358_v33, %v358_v33  ;;  %v365_v57 = vstv %s1059_s30  ;;  %v388_v63 = vmul.u32 128, %v380_v53  ;;  %s1099_s30 = scalar_lea.hbm %s1151_s4, %s562_s15 }
  0x7e   : > { %s740_s1 = scalar_lea.vmem %s1101_s13, 16  ;;  %p1168_p1 = scmp.ne.s32.totalorder %s1160_s27, 0 }
  0x7f   : > { %v304_v2 = vstv %s303_s10  ;;  %v333_v12 = vstv %s330_s8  ;;  %v363_v52 = vsub.f32 %v359_v46, %v361_v43  ;;  %v364_v56 = vsub.f32 %v360_v49, %v362_v50  ;;  %s419_s10 = scalar_lea.sflag [#allocation6], %s1045_s11  ;;  %p741_p12 = scmp.ne.s32.totalorder %s1101_s13, %s740_s1 }
  0x80   : > { %v1063_v3 = vmul.f32 %v304_v2, %v297_v0  ;;  %v1065_v4 = vmul.f32 %v304_v2, %v298_v1  ;;  %v334_v13 = vstv %s332_s7  ;;  %v389_v2 = vadd.s32 %v387_v60, %v382_v59  ;;  %s841_s20 = smov [#allocation11]  }
  0x81   : > { %v323_v15 = vstv %s321_s9  ;;  %v366_v61 = vmul.f32 %v365_v57, %v363_v52  ;;  %v367_v0 = vmul.f32 %v365_v57, %v364_v56  ;;  %p742_p0 = pnand %p741_p12, %p1168_p1  ;;  %s744_s26 = sshll.u32 %s841_s20, 4  ;;  %s745_s26 = int_to_ptr.vmem [resolvable:$false] %s744_s26 }
  0x82   : > { %v311_v5 = vand.u32 2147483647, %v1063_v3  ;;  %v312_v6 = vand.u32 2147483647, %v1065_v4  ;;  %vm307_vm0 = vcmp.ge.f32.partialorder %v1063_v3, 0.0  ;;  %vm308_vm1 = vcmp.ge.f32.partialorder %v1065_v4, 0.0  ;;  %p747_p10 = scmp.lt.s32.totalorder %s1101_s13, %s745_s26 }
  0x83   : > { %v324_v16 = vstv %s322_s24  ;;  %v335_v18 = vsel %vm307_vm0, %v333_v12, %v334_v13  ;;  %v336_v19 = vsel %vm308_vm1, %v333_v12, %v334_v13  ;;  %v343_v22 = vsel %vm307_vm0, %v334_v13, %v333_v12  ;;  %p743_p4 = pneg %p742_p0  ;;  %s746_s16 = scalar_lea.vmem %s745_s26, 32 }
  0x84   : > { %v313_v7 = vsub.f32 0.0, %v311_v5  ;;  %v314_v8 = vsub.f32 0.0, %v312_v6  ;;  %v325_v21 = vsel %vm307_vm0, %v323_v15, %v324_v16  ;;  %v326_v26 = vsel %vm308_vm1, %v323_v15, %v324_v16  ;;  %p748_p11 = scmp.lt.s32.totalorder %s746_s16, %s740_s1 }
  0x85   : > { %v344_v29 = vsel %vm308_vm1, %v334_v13, %v333_v12  ;;  %v351_v32 = vsel %vm307_vm0, %v324_v16, %v323_v15  ;;  %v352_v37 = vsel %vm308_vm1, %v324_v16, %v323_v15  ;;  %v309_v55 = vsel %vm307_vm0, 4.0, %v839_v54 }
  0x86   : > { %v315_v9 = vmul.f32 1.442695, %v313_v7  ;;  %v317_v10 = vmul.f32 1.442695, %v314_v8  ;;  %v310_v58 = vsel %vm308_vm1, 4.0, %v839_v54  ;;  %v368_v62 = vmul.f32 %v309_v55, %v1063_v3  ;;  %p749_p5 = por %p748_p11, %p747_p10 }
  0x87   : > { %v369_v1 = vmul.f32 %v310_v58, %v1065_v4  ;;  %v390_v6 = vadd.s32 %v388_v63, %v382_v59  ;;  %vm391_vm2 = vcmp.lt.s32.totalorder %v389_v2, 8  ;;  %v840_v3 = vmov 0.0  }
  0x88   : > { %659 = vpow2.f32 %v315_v9  ;;  %v370_v5 = vadd.f32 %v368_v62, %v366_v61  ;;  %295 = vst.msk [vmem:[#allocation2] sm:$0x1] %vm294_vm4, %v840_v3  ;;  %p750_p3 = pnand %p749_p5, %p743_p4 }
  0x89   : > { %661 = vpow2.f32 %v317_v10  ;;  %v371_v8 = vadd.f32 %v369_v1, %v367_v0  ;;  %vm392_vm3 = vcmp.lt.s32.totalorder %v390_v6, 8 }
  0x8f   : > { %v395_v23 = vld [vmem:[#allocation2] sm:$0x1] }
  0x92   : > { %v660_v20 = vpop.eup %659 }
  0x93   : > { %v662_v25 = vpop.eup %661  ;;  %v337_v27 = vmul.f32 %v660_v20, %v335_v18  ;;  %v341_v28 = vmul.f32 %v660_v20, %v660_v20 }
  0x94   : > { %v338_v30 = vmul.f32 %v662_v25, %v336_v19  ;;  %v342_v31 = vmul.f32 %v662_v25, %v662_v25 }
  0x95   : > { %v339_v34 = vadd.f32 %v337_v27, %v325_v21  ;;  %v345_v35 = vmul.f32 %v343_v22, %v341_v28  ;;  %v349_v36 = vmul.f32 %v660_v20, %v341_v28 }
  0x96   : > { %v340_v38 = vadd.f32 %v338_v30, %v326_v26  ;;  %v346_v39 = vmul.f32 %v344_v29, %v342_v31  ;;  %v350_v40 = vmul.f32 %v662_v25, %v342_v31 }
  0x97   : > { %v347_v41 = vadd.f32 %v345_v35, %v339_v34  ;;  %v353_v42 = vmul.f32 %v351_v32, %v349_v36 }
  0x98   : > { %v348_v44 = vadd.f32 %v346_v39, %v340_v38  ;;  %v354_v45 = vmul.f32 %v352_v37, %v350_v40 }
  0x99   : > { %v355_v48 = vadd.f32 %v353_v42, %v347_v41 }
  0x9a   : > { %v356_v51 = vadd.f32 %v354_v45, %v348_v44 }
  0x9b   : > { %663 = vlog2.f32 %v355_v48 }
  0x9c   : > { %665 = vlog2.f32 %v356_v51 }
  0xa5   : > { %v664_v7 = vpop.eup %663 }
  0xa6   : > { %v666_v9 = vpop.eup %665  ;;  %v373_v10 = vmul.f32 0.6931472, %v664_v7 }
  0xa7   : > { %v375_v11 = vmul.f32 0.6931472, %v666_v9 }
  0xa8   : > { %v376_v12 = vadd.f32 %v373_v10, %v370_v5 }
  0xa9   : > { %v377_v13 = vadd.f32 %v375_v11, %v371_v8 }
  0xaa   : > { %v393_v14 = vsel %vm391_vm2, %v376_v12, 0.0 }
  0xab   : > { %v394_v15 = vsel %vm392_vm3, %v377_v13, 0.0 }
  0xac   : > { %v396_v16 = vadd.f32 %v394_v15, %v393_v14 }
  0xae   : > { %397 = vadd.xlane.f32.xlu0 %v396_v16 }
 0x13b   : > { %v398_v4 = vpop.xlane.xlu0 %397 }
 0x13c   : > { %v399_v17 = vrot.slane %v398_v4, 4 }
 0x13e   : > { %v400_v18 = vadd.f32 %v399_v17, %v398_v4 }
 0x140   : > { %v401_v19 = vrot.slane %v400_v18, 2 }
 0x142   : > { %v402_v20 = vadd.f32 %v401_v19, %v400_v18 }
 0x144   : > { %v403_v21 = vrot.slane %v402_v20, 1 }
 0x146   : > { %v404_v22 = vadd.f32 %v403_v21, %v402_v20 }
 0x148   : > { %571 = vpush %v404_v22 }
 0x179   : > { %s572_s2 = spop %571 }
 0x17a   : > { %v406_v24 = vstv %s572_s2 }
 0x17b   : > { %v407_v25 = vadd.f32 %v406_v24, %v395_v23 }
 0x17d   : > { %409 = vst.msk [vmem:[#allocation2] sm:$0x1] %vm294_vm4, %v407_v25 }
 0x184   : > { %v413_v26 = vld [vmem:[#allocation2] sm:$0x1] }
 0x185   : > { %573 = vpush %v413_v26 }
 0x1b6   : > { %s574_s5 = spop %573 }
 0x1b7   : > { %s415_s0 = smul.f32 0.125, %s574_s5 }
 0x1b9   : > { %v416_v27 = vstv %s415_s0 }
 0x1ba   : > { %417 = vst [vmem:[%s287_s12] sm:$0x1] %v416_v27 }
 0x1bb   : > { %753 = shalt.err (!%p750_p3)
}
 0x1bc   : > { %s754_s11 = scalar_lea.hbm %s1099_s30, 16  ;;  %s758_s7 = scalar_lea.hbm %s1151_s4, 48 }
 0x1bd   : > { %p755_p7 = scmp.ne.s32.totalorder %s1099_s30, %s754_s11  ;;  %p759_p9 = scmp.lt.u32.totalorder %s1099_s30, %s1151_s4 }
 0x1be   : > { %p760_p2 = scmp.lt.u32.totalorder %s758_s7, %s754_s11  ;;  %p762_p12 = scmp.lt.u32.totalorder %s754_s11, %s1099_s30 }
 0x1bf   : > { %p756_p6 = pnand %p755_p7, %p1168_p1 }
 0x1c0   : > { %p761_p8 = por %p760_p2, %p759_p9 }
 0x1c1   : > { %p757_p13 = pneg %p756_p6 }
 0x1c2   : > { %p763_p0 = por %p762_p12, %p761_p8 }
 0x1c4   : > { %p764_p4 = pnand %p763_p0, %p757_p13 }
 0x1c6   : > { %767 = shalt.err (!%p764_p4)
}
 0x1c7   : > { %583 = dma.vmem_to_hbm [thread:$0]  (%p1168_p1), %s1101_s13, 16, %s1099_s30, %s419_s10  }
 0x1c8 PF: > { %p603_p10 = scmp.ge.s32.totalorder %s830_s22, 2  ;;  %s443_s2 = sand.u32 1, %s810_s17  }
 0x1c9   : > { %p1169_p11 = scmp.ne.s32.totalorder %s1161_s28, 0  ;;  %s444_s12 = scalar_lea.sflag [#allocation6], %s443_s2 }
 0x1cb   : > { %p597_p5 = pnand %p603_p10, %p1169_p11 }
 0x1cd   : > { %805 = dma.done.wait (!%p597_p5), %s444_s12, 16  }
 0x1ce   : > { %807 = vsyncadd (!%p597_p5), %s444_s12, 4294967280  ;;  %s25_s22 = sadd.s32 1, %s830_s22   ;;  %s1170_s17 = smov %s814_s18 }
 0x1cf   : > { %p22_p3 = scmp.ge.s32.totalorder %s25_s22, 5   ;;  %s1171_s18 = smov %s818_s19 }
 0x1d0   : > { %s1172_s19 = smov %s973_s14  ;;  %s1173_s20 = smov %s826_s21 }
 0x1d1   : > { %s1174_s21 = smov %s1176_s6  ;;  %24 = sbr.rel (!%p22_p3) target bundleno = 13 (0xd), region = 107 }
 0x1d8   :  { %448 = vsyncpa [#allocation5], 1 }
 0x1d9   :  { %450 = vsyncpa [#allocation5 + $0x1], 1 }
 0x1da   :  { %451 = vsyncpa [#allocation10], 1 }
 0x1db   :  { %453 = vsyncpa [#allocation10 + $0x1], 1 }
 0x1dc   :  { %454 = vsyncpa [#allocation6], 1 }
 0x1dd   :  { %456 = vsyncpa [#allocation6 + $0x1], 1 }
 0x1de   :  { %457 = vsyncpa [#allocation7], 1 }
 0x1df   :  { %459 = vsyncpa [#allocation7 + $0x1], 1 }

</bundles_post_ra>
